<compile_context>
chip_gen: v7x
topology: tpu7x:2x2x1
jax: 0.10.0
libtpu: 0.0.40
codegen_flags: <defaults>
</compile_context>

<pallas_src>
import math

import jax
import jax.numpy as jnp
from jax.experimental import pallas as pl
from jax.experimental.pallas import tpu as pltpu


# ----------------------------------------------------------------------------
# Kernel
# ----------------------------------------------------------------------------
def cvae_kernel(x_ref, eps_ref,
                w1_ref, w2_ref, wh_ref, w3z_ref, w3c_ref, w4_ref,
                b_ref, out_ref):
    x = x_ref[...]          # (Bt, cond+item)  f32
    eps = eps_ref[...]      # (Bt, latent)     f32

    hidden = w1_ref.shape[1]
    heads_w = wh_ref.shape[1]      # 2 * latent
    item_pad = w4_ref.shape[1]     # item_dim rounded up to 128
    latent = eps_ref.shape[1]
    cond_dim = w3c_ref.shape[0]

    def mm(a, w_ref):
        # bf16 MXU operands, f32 accumulation.
        return jnp.dot(a.astype(w_ref.dtype), w_ref[...],
                       preferred_element_type=jnp.float32)

    # Stacked biases (f32): rows = [b1, b2, b_heads, b3, b4_pad]
    b1 = b_ref[0:1, :hidden]
    b2 = b_ref[1:2, :hidden]
    bh = b_ref[2:3, :heads_w]
    b3 = b_ref[3:4, :hidden]
    b4 = b_ref[4:5, :item_pad]

    # ----- encoder -----
    h1 = jnp.maximum(mm(x, w1_ref) + b1, 0.0)
    h2 = jnp.maximum(mm(h1, w2_ref) + b2, 0.0)

    # ----- fused mu/logvar head: heads = [mu | logvar], lane-dense -----
    heads = mm(h2, wh_ref) + bh
    mu = heads[:, :latent]
    logvar = heads[:, latent:]

    # ----- reparameterization (f32): z = mu + eps * exp(0.5 * logvar) -----
    z = mu + eps * jnp.exp(0.5 * logvar)

    # ----- decoder: split matmul over [z, cond] (cond sliced from x) -----
    cond = x[:, :cond_dim]
    h3 = jnp.maximum(mm(z, w3z_ref) + mm(cond, w3c_ref) + b3, 0.0)
    recon = jax.nn.sigmoid(mm(h3, w4_ref) + b4)

    # ----- single lane-dense packed output: [recon_pad | mu | logvar] -----
    out_ref[:, :item_pad] = recon.astype(out_ref.dtype)
    out_ref[:, item_pad:] = heads.astype(out_ref.dtype)


# ----------------------------------------------------------------------------
# Wrapper
# ----------------------------------------------------------------------------
@jax.jit
def cvae_forward(cond, item, eps, packed):
    # Feature-dim concat is free in XLA; saves one MXU push + two DMAs in-kernel.
    x = jnp.concatenate([cond, item], axis=1)
    B, in_dim = x.shape
    item_dim = item.shape[1]
    latent = eps.shape[1]
    cond_dim = packed["w3c"].shape[0]
    hidden = packed["w1"].shape[1]
    heads_w = packed["wh"].shape[1]
    item_pad = packed["w4"].shape[1]
    out_w = item_pad + heads_w

    tile_b = B if B <= 128 else 128
    grid = (pl.cdiv(B, tile_b),)

    def tiled(shape):
        return pl.BlockSpec(shape, lambda i: (i, 0))

    def resident(shape):
        return pl.BlockSpec(shape, lambda i: (0, 0))

    inputs = (x, eps,
              packed["w1"], packed["w2"], packed["wh"],
              packed["w3z"], packed["w3c"], packed["w4"],
              packed["biases"])

    in_specs = [
        tiled((tile_b, in_dim)),
        tiled((tile_b, latent)),
        resident(packed["w1"].shape),
        resident(packed["w2"].shape),
        resident(packed["wh"].shape),
        resident(packed["w3z"].shape),
        resident(packed["w3c"].shape),
        resident(packed["w4"].shape),
        resident(packed["biases"].shape),
    ]
    out_specs = tiled((tile_b, out_w))

    def nbytes(a):
        return math.prod(a.shape) * a.dtype.itemsize

    flops = 2 * B * hidden * (in_dim + hidden + heads_w + latent
                              + cond_dim + item_pad)
    transcendentals = B * (latent + item_pad)          # exp + sigmoid
    bytes_accessed = sum(nbytes(a) for a in inputs) + B * out_w * 4

    out = pl.pallas_call(
        cvae_kernel,
        out_shape=jax.ShapeDtypeStruct((B, out_w), jnp.float32),
        grid=grid,
        in_specs=in_specs,
        out_specs=out_specs,
        compiler_params=pltpu.CompilerParams(
            dimension_semantics=("parallel",),
            vmem_limit_bytes=4 << 20),
        cost_estimate=pl.CostEstimate(
            flops=flops,
            transcendentals=transcendentals,
            bytes_accessed=bytes_accessed),
    )(*inputs)

    recon = out[:, :item_dim]
    mu = out[:, item_pad:item_pad + latent]
    logvar = out[:, item_pad + latent:item_pad + 2 * latent]
    return recon, mu, logvar


# ----------------------------------------------------------------------------
# Parameters
# ----------------------------------------------------------------------------
def init_params(key, cond_dim, item_dim, hidden_dim=128, latent_dim=64):
    """PyTorch-style uniform init; weights stored (in_features, out_features)."""
    def linear(k, fan_in, fan_out):
        kw, kb = jax.random.split(k)
        bound = 1.0 / math.sqrt(fan_in)
        w = jax.random.uniform(kw, (fan_in, fan_out), jnp.float32, -bound, bound)
        b = jax.random.uniform(kb, (1, fan_out), jnp.float32, -bound, bound)
        return w, b

    ks = jax.random.split(key, 6)
    w1, b1 = linear(ks[0], cond_dim + item_dim, hidden_dim)
    w2, b2 = linear(ks[1], hidden_dim, hidden_dim)
    wmu, bmu = linear(ks[2], hidden_dim, latent_dim)
    wlv, blv = linear(ks[3], hidden_dim, latent_dim)
    w3, b3 = linear(ks[4], latent_dim + cond_dim, hidden_dim)
    w4, b4 = linear(ks[5], hidden_dim, item_dim)
    return dict(w1=w1, b1=b1, w2=w2, b2=b2, wmu=wmu, bmu=bmu,
                wlv=wlv, blv=blv, w3=w3, b3=b3, w4=w4, b4=b4)


def _round_up(n, m):
    return ((n + m - 1) // m) * m


def pack_params(p, item_dim, latent_dim, mxu_dtype=jnp.bfloat16):
    """Fuse / pad / stack parameters for the kernel.

    - wmu|wlv and bmu|blv fused into one 128-wide head.
    - w3 split over [z, cond] (z is produced in-kernel).
    - w4/b4 zero-padded to a 128-lane-dense output.
    - all biases stacked into one (5, 128) f32 array.
    - weights cast to bf16 for the MXU (halves weight DMA bytes).
    """
    hidden_dim = p["w1"].shape[1]
    item_pad = _round_up(item_dim, 128)

    wh = jnp.concatenate([p["wmu"], p["wlv"]], axis=1)        # (H, 2L)
    bh = jnp.concatenate([p["bmu"], p["blv"]], axis=1)        # (1, 2L)
    w3z = p["w3"][:latent_dim]
    w3c = p["w3"][latent_dim:]
    w4p = jnp.pad(p["w4"], ((0, 0), (0, item_pad - item_dim)))
    b4p = jnp.pad(p["b4"], ((0, 0), (0, item_pad - item_dim)))

    bias_w = max(hidden_dim, 2 * latent_dim, item_pad)

    def row(b):
        return jnp.pad(b, ((0, 0), (0, bias_w - b.shape[1])))

    biases = jnp.concatenate(
        [row(p["b1"]), row(p["b2"]), row(bh), row(p["b3"]), row(b4p)], axis=0)

    cast = lambda w: w.astype(mxu_dtype)
    return dict(w1=cast(p["w1"]), w2=cast(p["w2"]), wh=cast(wh),
                w3z=cast(w3z), w3c=cast(w3c), w4=cast(w4p),
                biases=biases.astype(jnp.float32))


# ----------------------------------------------------------------------------
# Pure-JAX reference (matches the PyTorch forward given the same eps)
# ----------------------------------------------------------------------------
def cvae_reference(cond, item, eps, p):
    x = jnp.concatenate([cond, item], axis=1)
    h = jax.nn.relu(x @ p["w1"] + p["b1"])
    h = jax.nn.relu(h @ p["w2"] + p["b2"])
    mu = h @ p["wmu"] + p["bmu"]
    logvar = h @ p["wlv"] + p["blv"]
    z = mu + eps * jnp.exp(0.5 * logvar)
    xd = jnp.concatenate([z, cond], axis=1)
    hd = jax.nn.relu(xd @ p["w3"] + p["b3"])
    recon = jax.nn.sigmoid(hd @ p["w4"] + p["b4"])
    return recon, mu, logvar


if __name__ == "__main__":
    B, COND_DIM, ITEM_DIM = 8, 16, 32
    HIDDEN_DIM, LATENT_DIM = 128, 64

    key = jax.random.PRNGKey(0)
    k_cond, k_item, k_eps, k_params = jax.random.split(key, 4)

    cond = jax.random.normal(k_cond, (B, COND_DIM), jnp.float32)
    item = jax.random.uniform(k_item, (B, ITEM_DIM), jnp.float32)
    # TODO(synk): eps (torch.randn_like in reparameterize) is passed in
    # explicitly for deterministic parity; could use pltpu.prng_* in-kernel.
    eps = jax.random.normal(k_eps, (B, LATENT_DIM), jnp.float32)

    params = init_params(k_params, COND_DIM, ITEM_DIM, HIDDEN_DIM, LATENT_DIM)
    packed = pack_params(params, ITEM_DIM, LATENT_DIM)

    recon, mu, logvar = cvae_forward(cond, item, eps, packed)
    jax.block_until_ready((recon, mu, logvar))

    r_ref, mu_ref, lv_ref = cvae_reference(cond, item, eps, params)
    assert recon.shape == (B, ITEM_DIM)
    assert mu.shape == (B, LATENT_DIM) and logvar.shape == (B, LATENT_DIM)
    # Tolerance accounts for bf16 MXU operands (f32 accumulation).
    assert jnp.allclose(recon, r_ref, atol=5e-2), "recon mismatch"
    assert jnp.allclose(mu, mu_ref, atol=5e-2), "mu mismatch"
    assert jnp.allclose(logvar, lv_ref, atol=5e-2), "logvar mismatch"

    print("KERNEL_OK")
</pallas_src>

<mosaic_0001>
module attributes {stable_mosaic.version = 11 : i64} {
  func.func @cvae_kernel(%arg0: i32, %arg1: memref<8x48xf32, #tpu.memory_space<vmem>>, %arg2: memref<8x64xf32, #tpu.memory_space<vmem>>, %arg3: memref<48x128xbf16, #tpu.memory_space<vmem>>, %arg4: memref<128x128xbf16, #tpu.memory_space<vmem>>, %arg5: memref<128x128xbf16, #tpu.memory_space<vmem>>, %arg6: memref<64x128xbf16, #tpu.memory_space<vmem>>, %arg7: memref<16x128xbf16, #tpu.memory_space<vmem>>, %arg8: memref<128x128xbf16, #tpu.memory_space<vmem>>, %arg9: memref<5x128xf32, #tpu.memory_space<vmem>>, %arg10: memref<8x256xf32, #tpu.memory_space<vmem>>) attributes {dimension_semantics = [#tpu.dimension_semantics<parallel>], iteration_bounds = array<i64: 1>, scalar_prefetch = 0 : i64, scratch_operands = 0 : i64, tpu.core_type = #tpu.core_type<tc>, window_params = [{transform_indices = @transform_0, window_bounds = array<i64: 8, 48>}, {transform_indices = @transform_1, window_bounds = array<i64: 8, 64>}, {pipeline_mode = #tpu.pipeline_mode<synchronous>, transform_indices = @transform_2, window_bounds = array<i64: 48, 128>}, {pipeline_mode = #tpu.pipeline_mode<synchronous>, transform_indices = @transform_3, window_bounds = array<i64: 128, 128>}, {pipeline_mode = #tpu.pipeline_mode<synchronous>, transform_indices = @transform_4, window_bounds = array<i64: 128, 128>}, {pipeline_mode = #tpu.pipeline_mode<synchronous>, transform_indices = @transform_5, window_bounds = array<i64: 64, 128>}, {pipeline_mode = #tpu.pipeline_mode<synchronous>, transform_indices = @transform_6, window_bounds = array<i64: 16, 128>}, {pipeline_mode = #tpu.pipeline_mode<synchronous>, transform_indices = @transform_7, window_bounds = array<i64: 128, 128>}, {pipeline_mode = #tpu.pipeline_mode<synchronous>, transform_indices = @transform_8, window_bounds = array<i64: 5, 128>}, {transform_indices = @transform_9, window_bounds = array<i64: 8, 256>}]} {
    %c0 = arith.constant 0 : index
    %c0_0 = arith.constant 0 : index
    %0 = vector.load %arg1[%c0, %c0_0] : memref<8x48xf32, #tpu.memory_space<vmem>>, vector<8x48xf32>
    %c0_1 = arith.constant 0 : index
    %c0_2 = arith.constant 0 : index
    %1 = vector.load %arg2[%c0_1, %c0_2] : memref<8x64xf32, #tpu.memory_space<vmem>>, vector<8x64xf32>
    %c0_3 = arith.constant 0 : index
    %c0_4 = arith.constant 0 : index
    %2 = vector.load %arg9[%c0_3, %c0_4] : memref<5x128xf32, #tpu.memory_space<vmem>>, vector<1x128xf32>
    %c1 = arith.constant 1 : index
    %c0_5 = arith.constant 0 : index
    %3 = vector.load %arg9[%c1, %c0_5] : memref<5x128xf32, #tpu.memory_space<vmem>>, vector<1x128xf32>
    %c2 = arith.constant 2 : index
    %c0_6 = arith.constant 0 : index
    %4 = vector.load %arg9[%c2, %c0_6] : memref<5x128xf32, #tpu.memory_space<vmem>>, vector<1x128xf32>
    %c3 = arith.constant 3 : index
    %c0_7 = arith.constant 0 : index
    %5 = vector.load %arg9[%c3, %c0_7] : memref<5x128xf32, #tpu.memory_space<vmem>>, vector<1x128xf32>
    %c4 = arith.constant 4 : index
    %c0_8 = arith.constant 0 : index
    %6 = vector.load %arg9[%c4, %c0_8] : memref<5x128xf32, #tpu.memory_space<vmem>>, vector<1x128xf32>
    %7 = arith.truncf %0 : vector<8x48xf32> to vector<8x48xbf16>
    %c0_9 = arith.constant 0 : index
    %c0_10 = arith.constant 0 : index
    %8 = vector.load %arg3[%c0_9, %c0_10] : memref<48x128xbf16, #tpu.memory_space<vmem>>, vector<48x128xbf16>
    %cst = arith.constant dense<0.000000e+00> : vector<8x128xf32>
    %9 = tpu.matmul %7, %8, %cst {dimension_numbers = #tpu.dot_dimension_numbers<[1], [0], [0], [1], [0, 0, 1, 1], [], []>} : vector<8x48xbf16>, vector<48x128xbf16>, vector<8x128xf32> -> vector<8x128xf32>
    %10 = vector.broadcast %2 : vector<1x128xf32> to vector<8x128xf32>
    %11 = arith.addf %9, %10 : vector<8x128xf32>
    %cst_11 = arith.constant 0.000000e+00 : f32
    %12 = vector.broadcast %cst_11 : f32 to vector<8x128xf32>
    %13 = arith.maximumf %11, %12 : vector<8x128xf32>
    %14 = arith.truncf %13 : vector<8x128xf32> to vector<8x128xbf16>
    %c0_12 = arith.constant 0 : index
    %c0_13 = arith.constant 0 : index
    %15 = vector.load %arg4[%c0_12, %c0_13] : memref<128x128xbf16, #tpu.memory_space<vmem>>, vector<128x128xbf16>
    %cst_14 = arith.constant dense<0.000000e+00> : vector<8x128xf32>
    %16 = tpu.matmul %14, %15, %cst_14 {dimension_numbers = #tpu.dot_dimension_numbers<[1], [0], [0], [1], [0, 0, 1, 1], [], []>} : vector<8x128xbf16>, vector<128x128xbf16>, vector<8x128xf32> -> vector<8x128xf32>
    %17 = vector.broadcast %3 : vector<1x128xf32> to vector<8x128xf32>
    %18 = arith.addf %16, %17 : vector<8x128xf32>
    %cst_15 = arith.constant 0.000000e+00 : f32
    %19 = vector.broadcast %cst_15 : f32 to vector<8x128xf32>
    %20 = arith.maximumf %18, %19 : vector<8x128xf32>
    %21 = arith.truncf %20 : vector<8x128xf32> to vector<8x128xbf16>
    %c0_16 = arith.constant 0 : index
    %c0_17 = arith.constant 0 : index
    %22 = vector.load %arg5[%c0_16, %c0_17] : memref<128x128xbf16, #tpu.memory_space<vmem>>, vector<128x128xbf16>
    %cst_18 = arith.constant dense<0.000000e+00> : vector<8x128xf32>
    %23 = tpu.matmul %21, %22, %cst_18 {dimension_numbers = #tpu.dot_dimension_numbers<[1], [0], [0], [1], [0, 0, 1, 1], [], []>} : vector<8x128xbf16>, vector<128x128xbf16>, vector<8x128xf32> -> vector<8x128xf32>
    %24 = vector.broadcast %4 : vector<1x128xf32> to vector<8x128xf32>
    %25 = arith.addf %23, %24 : vector<8x128xf32>
    %26 = vector.extract_strided_slice %25 {offsets = [0, 0], sizes = [8, 64], strides = [1, 1]} : vector<8x128xf32> to vector<8x64xf32>
    %27 = vector.extract_strided_slice %25 {offsets = [0, 64], sizes = [8, 64], strides = [1, 1]} : vector<8x128xf32> to vector<8x64xf32>
    %cst_19 = arith.constant 5.000000e-01 : f32
    %28 = vector.broadcast %cst_19 : f32 to vector<8x64xf32>
    %29 = arith.mulf %28, %27 : vector<8x64xf32>
    %30 = math.exp %29 : vector<8x64xf32>
    %31 = arith.mulf %1, %30 : vector<8x64xf32>
    %32 = arith.addf %26, %31 : vector<8x64xf32>
    %33 = vector.extract_strided_slice %0 {offsets = [0, 0], sizes = [8, 16], strides = [1, 1]} : vector<8x48xf32> to vector<8x16xf32>
    %34 = arith.truncf %32 : vector<8x64xf32> to vector<8x64xbf16>
    %c0_20 = arith.constant 0 : index
    %c0_21 = arith.constant 0 : index
    %35 = vector.load %arg6[%c0_20, %c0_21] : memref<64x128xbf16, #tpu.memory_space<vmem>>, vector<64x128xbf16>
    %cst_22 = arith.constant dense<0.000000e+00> : vector<8x128xf32>
    %36 = tpu.matmul %34, %35, %cst_22 {dimension_numbers = #tpu.dot_dimension_numbers<[1], [0], [0], [1], [0, 0, 1, 1], [], []>} : vector<8x64xbf16>, vector<64x128xbf16>, vector<8x128xf32> -> vector<8x128xf32>
    %37 = arith.truncf %33 : vector<8x16xf32> to vector<8x16xbf16>
    %c0_23 = arith.constant 0 : index
    %c0_24 = arith.constant 0 : index
    %38 = vector.load %arg7[%c0_23, %c0_24] : memref<16x128xbf16, #tpu.memory_space<vmem>>, vector<16x128xbf16>
    %cst_25 = arith.constant dense<0.000000e+00> : vector<8x128xf32>
    %39 = tpu.matmul %37, %38, %cst_25 {dimension_numbers = #tpu.dot_dimension_numbers<[1], [0], [0], [1], [0, 0, 1, 1], [], []>} : vector<8x16xbf16>, vector<16x128xbf16>, vector<8x128xf32> -> vector<8x128xf32>
    %40 = arith.addf %36, %39 : vector<8x128xf32>
    %41 = vector.broadcast %5 : vector<1x128xf32> to vector<8x128xf32>
    %42 = arith.addf %40, %41 : vector<8x128xf32>
    %cst_26 = arith.constant 0.000000e+00 : f32
    %43 = vector.broadcast %cst_26 : f32 to vector<8x128xf32>
    %44 = arith.maximumf %42, %43 : vector<8x128xf32>
    %45 = arith.truncf %44 : vector<8x128xf32> to vector<8x128xbf16>
    %c0_27 = arith.constant 0 : index
    %c0_28 = arith.constant 0 : index
    %46 = vector.load %arg8[%c0_27, %c0_28] : memref<128x128xbf16, #tpu.memory_space<vmem>>, vector<128x128xbf16>
    %cst_29 = arith.constant dense<0.000000e+00> : vector<8x128xf32>
    %47 = tpu.matmul %45, %46, %cst_29 {dimension_numbers = #tpu.dot_dimension_numbers<[1], [0], [0], [1], [0, 0, 1, 1], [], []>} : vector<8x128xbf16>, vector<128x128xbf16>, vector<8x128xf32> -> vector<8x128xf32>
    %48 = vector.broadcast %6 : vector<1x128xf32> to vector<8x128xf32>
    %49 = arith.addf %47, %48 : vector<8x128xf32>
    %50 = arith.negf %49 : vector<8x128xf32>
    %51 = math.exp %50 : vector<8x128xf32>
    %cst_30 = arith.constant 1.000000e+00 : f32
    %52 = vector.broadcast %cst_30 : f32 to vector<8x128xf32>
    %53 = arith.addf %52, %51 : vector<8x128xf32>
    %54 = arith.divf %52, %53 : vector<8x128xf32>
    %c0_31 = arith.constant 0 : index
    %c0_32 = arith.constant 0 : index
    %55 = vector.load %arg10[%c0_31, %c0_32] : memref<8x256xf32, #tpu.memory_space<vmem>>, vector<8x128xf32>
    tpu.vector_store %arg10[%c0_31, %c0_32], %54 {strides = array<i32>} : memref<8x256xf32, #tpu.memory_space<vmem>>, vector<8x128xf32>,
    %c0_33 = arith.constant 0 : index
    %c128 = arith.constant 128 : index
    %56 = vector.load %arg10[%c0_33, %c128] : memref<8x256xf32, #tpu.memory_space<vmem>>, vector<8x128xf32>
    tpu.vector_store %arg10[%c0_33, %c128], %25 {strides = array<i32>} : memref<8x256xf32, #tpu.memory_space<vmem>>, vector<8x128xf32>,
    return
  }
  func.func @transform_0(%arg0: i32) -> (i32, i32) {
    %c0_i32 = arith.constant 0 : i32
    %c0_i32_0 = arith.constant 0 : i32
    return %arg0, %c0_i32 : i32, i32
  }
  func.func @transform_1(%arg0: i32) -> (i32, i32) {
    %c0_i32 = arith.constant 0 : i32
    %c0_i32_0 = arith.constant 0 : i32
    return %arg0, %c0_i32 : i32, i32
  }
  func.func @transform_2(%arg0: i32) -> (i32, i32) {
    %c0_i32 = arith.constant 0 : i32
    %c0_i32_0 = arith.constant 0 : i32
    %c0_i32_1 = arith.constant 0 : i32
    return %c0_i32, %c0_i32_0 : i32, i32
  }
  func.func @transform_3(%arg0: i32) -> (i32, i32) {
    %c0_i32 = arith.constant 0 : i32
    %c0_i32_0 = arith.constant 0 : i32
    %c0_i32_1 = arith.constant 0 : i32
    return %c0_i32, %c0_i32_0 : i32, i32
  }
  func.func @transform_4(%arg0: i32) -> (i32, i32) {
    %c0_i32 = arith.constant 0 : i32
    %c0_i32_0 = arith.constant 0 : i32
    %c0_i32_1 = arith.constant 0 : i32
    return %c0_i32, %c0_i32_0 : i32, i32
  }
  func.func @transform_5(%arg0: i32) -> (i32, i32) {
    %c0_i32 = arith.constant 0 : i32
    %c0_i32_0 = arith.constant 0 : i32
    %c0_i32_1 = arith.constant 0 : i32
    return %c0_i32, %c0_i32_0 : i32, i32
  }
  func.func @transform_6(%arg0: i32) -> (i32, i32) {
    %c0_i32 = arith.constant 0 : i32
    %c0_i32_0 = arith.constant 0 : i32
    %c0_i32_1 = arith.constant 0 : i32
    return %c0_i32, %c0_i32_0 : i32, i32
  }
  func.func @transform_7(%arg0: i32) -> (i32, i32) {
    %c0_i32 = arith.constant 0 : i32
    %c0_i32_0 = arith.constant 0 : i32
    %c0_i32_1 = arith.constant 0 : i32
    return %c0_i32, %c0_i32_0 : i32, i32
  }
  func.func @transform_8(%arg0: i32) -> (i32, i32) {
    %c0_i32 = arith.constant 0 : i32
    %c0_i32_0 = arith.constant 0 : i32
    %c0_i32_1 = arith.constant 0 : i32
    return %c0_i32, %c0_i32_0 : i32, i32
  }
  func.func @transform_9(%arg0: i32) -> (i32, i32) {
    %c0_i32 = arith.constant 0 : i32
    %c0_i32_0 = arith.constant 0 : i32
    return %arg0, %c0_i32 : i32, i32
  }
}

</mosaic_0001>

<bundles_post_ra>
// kernel: cvae_forward.1
= control target key start
LH: loop header
LB: loop body
LE: loop exit
PB: predicated region body
PF: predicated region fallthrough
CT: control target
= control target key end

     0   :  { %14 = vsyncpa [#allocation3], 0  ;;  %s1267_s0 = inlined_call_operand.vmem [shape: f32[8,48], index: 0, kind: input, shape index: {}]   ;;  %s1268_s1 = inlined_call_operand.vmem [shape: f32[8,64], index: 1, kind: input, shape index: {}]   ;;  %s1269_s2 = inlined_call_operand.vmem [shape: bf16[48,128], index: 2, kind: input, shape index: {}]   ;;  %s1270_s3 = inlined_call_operand.hbm [shape: bf16[128,128], index: 3, kind: input, shape index: {}]   ;;  %s1271_s4 = inlined_call_operand.hbm [shape: bf16[128,128], index: 4, kind: input, shape index: {}]   ;;  %s1272_s5 = inlined_call_operand.hbm [shape: bf16[64,128], index: 5, kind: input, shape index: {}]   ;;  %s1273_s6 = inlined_call_operand.hbm [shape: bf16[16,128], index: 6, kind: input, shape index: {}]   ;;  %s1274_s7 = inlined_call_operand.hbm [shape: bf16[128,128], index: 7, kind: input, shape index: {}]   ;;  %s1275_s8 = inlined_call_operand.hbm [shape: f32[5,128], index: 8, kind: input, shape index: {}]   ;;  %s1276_s9 = inlined_call_operand.vmem [shape: f32[8,256], index: 9, kind: output, shape index: {}]  }
   0x1   :  { %15 = vsyncpa [#allocation5], 0 }
   0x2   :  { %16 = vsyncpa [#allocation8], 0 }
   0x3   :  { %17 = vsyncpa [#allocation11], 0  ;;  %s1036_s30 = smov [#allocation4]   ;;  %s1037_s11 = smov [#allocation7]  }
   0x4   :  { %s41_s10 = sshll.u32 %s1036_s30, 4  ;;  %s65_s12 = sshll.u32 %s1037_s11, 4  ;;  %s42_s10 = int_to_ptr.vmem [resolvable:$true] %s41_s10  ;;  %s1096_s12 = int_to_ptr.vmem [resolvable:$true] %s65_s12 }
   0x5   :  { %s896_s15 = scalar_lea.hbm %s1271_s4, 1024 }
   0x6   :  { %p897_p0 = scmp.ne.s32.totalorder %s1271_s4, %s896_s15  ;;  %p900_p1 = scmp.lt.u32.totalorder %s896_s15, %s1271_s4 }
   0x8   :  { %p902_p2 = pnand %p900_p1, %p897_p0 }
   0xa   :  { %905 = shalt.err (!%p902_p2)
}
   0xb   :  { %s906_s20 = scalar_lea.vmem %s42_s10, 1024  ;;  %p911_p4 = scmp.lt.s32.totalorder %s42_s10, %s42_s10 }
   0xc   :  { %p907_p3 = scmp.ne.s32.totalorder %s42_s10, %s906_s20  ;;  %p912_p5 = scmp.lt.s32.totalorder %s906_s20, %s906_s20 }
   0xe   :  { %p913_p6 = por %p912_p5, %p911_p4 }
  0x10   :  { %p914_p7 = pnand %p913_p6, %p907_p3 }
  0x12   :  { %917 = shalt.err (!%p914_p7)
}
  0x13   :  { %s1038_s21 = smov 64   ;;  %s1039_s22 = smov 4  }
  0x14   :  { %47 = dma.hbm_to_vmem [thread:$0]  %s1271_s4, 1024, %s42_s10, [#allocation5], %s1038_s21, %s1038_s21, %s1039_s22  }
  0x15   :  { %s918_s27 = scalar_lea.hbm %s1273_s6, 128 }
  0x16   :  { %p919_p8 = scmp.ne.s32.totalorder %s1273_s6, %s918_s27  ;;  %p922_p9 = scmp.lt.u32.totalorder %s918_s27, %s1273_s6 }
  0x18   :  { %p924_p10 = pnand %p922_p9, %p919_p8 }
  0x1a   :  { %927 = shalt.err (!%p924_p10)
}
  0x1b   :  { %s928_s13 = scalar_lea.vmem %s1096_s12, 128  ;;  %p933_p12 = scmp.lt.s32.totalorder %s1096_s12, %s1096_s12 }
  0x1c   :  { %p929_p11 = scmp.ne.s32.totalorder %s1096_s12, %s928_s13  ;;  %p934_p13 = scmp.lt.s32.totalorder %s928_s13, %s928_s13 }
  0x1e   :  { %p935_p0 = por %p934_p13, %p933_p12 }
  0x20   :  { %p936_p1 = pnand %p935_p0, %p929_p11 }
  0x22   :  { %939 = shalt.err (!%p936_p1)
}
  0x23   :  { %71 = dma.hbm_to_vmem [thread:$0]  %s1273_s6, 128, %s1096_s12, [#allocation8], %s1038_s21, %s1038_s21, %s1039_s22  }
  0x24   :  { %s1040_s14 = smov [#allocation2]   ;;  %s1041_s16 = smov [#allocation6]  }
  0x25   :  { %s29_s15 = sshll.u32 %s1040_s14, 4  ;;  %s53_s17 = sshll.u32 %s1041_s16, 4  ;;  %s30_s15 = int_to_ptr.vmem [resolvable:$true] %s29_s15  ;;  %s1133_s17 = int_to_ptr.vmem [resolvable:$true] %s53_s17 }
  0x26   :  { %s940_s20 = scalar_lea.hbm %s1270_s3, 1024 }
  0x27   :  { %p941_p2 = scmp.ne.s32.totalorder %s1270_s3, %s940_s20  ;;  %p944_p3 = scmp.lt.u32.totalorder %s940_s20, %s1270_s3 }
  0x29   :  { %p946_p4 = pnand %p944_p3, %p941_p2 }
  0x2b   :  { %949 = shalt.err (!%p946_p4)
}
  0x2c   :  { %s950_s6 = scalar_lea.vmem %s30_s15, 1024  ;;  %p955_p6 = scmp.lt.s32.totalorder %s30_s15, %s30_s15 }
  0x2d   :  { %p951_p5 = scmp.ne.s32.totalorder %s30_s15, %s950_s6  ;;  %p956_p7 = scmp.lt.s32.totalorder %s950_s6, %s950_s6 }
  0x2f   :  { %p957_p8 = por %p956_p7, %p955_p6 }
  0x31   :  { %p958_p9 = pnand %p957_p8, %p951_p5 }
  0x33   :  { %961 = shalt.err (!%p958_p9)
}
  0x34   :  { %35 = dma.hbm_to_vmem [thread:$0]  %s1270_s3, 1024, %s30_s15, [#allocation3], %s1038_s21, %s1038_s21, %s1039_s22  }
  0x35   :  { %s962_s30 = scalar_lea.hbm %s1272_s5, 512 }
  0x36   :  { %p963_p10 = scmp.ne.s32.totalorder %s1272_s5, %s962_s30  ;;  %p966_p11 = scmp.lt.u32.totalorder %s962_s30, %s1272_s5 }
  0x38   :  { %p968_p12 = pnand %p966_p11, %p963_p10 }
  0x3a   :  { %971 = shalt.err (!%p968_p12)
}
  0x3b   :  { %s972_s14 = scalar_lea.vmem %s1133_s17, 512  ;;  %p977_p0 = scmp.lt.s32.totalorder %s1133_s17, %s1133_s17 }
  0x3c   :  { %p973_p13 = scmp.ne.s32.totalorder %s1133_s17, %s972_s14  ;;  %p978_p1 = scmp.lt.s32.totalorder %s972_s14, %s972_s14 }
  0x3e   :  { %p979_p2 = por %p978_p1, %p977_p0 }
  0x40   :  { %p980_p3 = pnand %p979_p2, %p973_p13 }
  0x42   :  { %983 = shalt.err (!%p980_p3)
}
  0x43   :  { %59 = dma.hbm_to_vmem [thread:$0]  %s1272_s5, 512, %s1133_s17, [#allocation5], %s1038_s21, %s1038_s21, %s1039_s22  }
  0x44   :  { %s1042_s16 = smov [#allocation9]   ;;  %s1043_s19 = smov [#allocation10]  }
  0x45   :  { %s77_s18 = sshll.u32 %s1042_s16, 4  ;;  %s90_s20 = sshll.u32 %s1043_s19, 4  ;;  %s78_s18 = int_to_ptr.vmem [resolvable:$true] %s77_s18  ;;  %s91_s20 = int_to_ptr.vmem [resolvable:$true] %s90_s20 }
  0x46   :  { %s984_s25 = scalar_lea.hbm %s1274_s7, 1024 }
  0x47   :  { %p985_p4 = scmp.ne.s32.totalorder %s1274_s7, %s984_s25  ;;  %p988_p5 = scmp.lt.u32.totalorder %s984_s25, %s1274_s7 }
  0x49   :  { %p990_p6 = pnand %p988_p5, %p985_p4 }
  0x4b   :  { %993 = shalt.err (!%p990_p6)
}
  0x4c   :  { %s994_s5 = scalar_lea.vmem %s78_s18, 1024  ;;  %p999_p8 = scmp.lt.s32.totalorder %s78_s18, %s78_s18 }
  0x4d   :  { %p995_p7 = scmp.ne.s32.totalorder %s78_s18, %s994_s5  ;;  %p1000_p9 = scmp.lt.s32.totalorder %s994_s5, %s994_s5 }
  0x4f   :  { %p1001_p10 = por %p1000_p9, %p999_p8 }
  0x51   :  { %p1002_p11 = pnand %p1001_p10, %p995_p7 }
  0x53   :  { %1005 = shalt.err (!%p1002_p11)
}
  0x54   :  { %83 = dma.hbm_to_vmem [thread:$0]  %s1274_s7, 1024, %s78_s18, [#allocation8], %s1038_s21, %s1038_s21, %s1039_s22  }
  0x55   :  { %s1006_s11 = scalar_lea.hbm %s1275_s8, 128 }
  0x56   :  { %p1007_p12 = scmp.ne.s32.totalorder %s1275_s8, %s1006_s11  ;;  %p1010_p13 = scmp.lt.u32.totalorder %s1006_s11, %s1275_s8 }
  0x58   :  { %p1012_p0 = pnand %p1010_p13, %p1007_p12 }
  0x5a   :  { %1015 = shalt.err (!%p1012_p0)
}
  0x5b   :  { %s1016_s3 = scalar_lea.vmem %s91_s20, 128  ;;  %p1021_p2 = scmp.lt.s32.totalorder %s91_s20, %s91_s20 }
  0x5c   :  { %p1017_p1 = scmp.ne.s32.totalorder %s91_s20, %s1016_s3  ;;  %p1022_p3 = scmp.lt.s32.totalorder %s1016_s3, %s1016_s3 }
  0x5e   :  { %p1023_p4 = por %p1022_p3, %p1021_p2 }
  0x60   :  { %p1024_p5 = pnand %p1023_p4, %p1017_p1 }
  0x62   :  { %1027 = shalt.err (!%p1024_p5)
}
  0x63   :  { %93 = dma.hbm_to_vmem [thread:$0]  %s1275_s8, 128, %s91_s20, [#allocation11]  }
  0x64   :  { %1028 = dma.done.wait [#allocation3], 1024  }
  0x65   :  { %1029 = vsyncadd [#allocation3], 4294966272 }
  0x66   :  { %1030 = dma.done.wait [#allocation5], 1536  }
  0x67   :  { %1031 = vsyncadd [#allocation5], 4294965760 }
  0x68   :  { %1032 = dma.done.wait [#allocation8], 1152  }
  0x69   :  { %1033 = vsyncadd [#allocation8], 4294966144 }
  0x6a   :  { %1034 = dma.done.wait [#allocation11], 128  }
  0x6b   :  { %1035 = vsyncadd [#allocation11], 4294967168  ;;  %v1044_v0 = vmov 0.0   ;;  %vm1045_vm0 = vmmov 0   ;;  %v858_v1 = vld [vmem:[%s1269_s2] sm:$0xff]   ;;  %v859_v2 = vld [vmem:[%s1269_s2 + $0x8] sm:$0xff]  }
  0x6c   :  { %760 = vmatprep.subr.bf16.mxu1 %v1044_v0  ;;  %766 = vmatprep.mubr.msk.bf16.mxu1 %vm1045_vm0, %v1044_v0  ;;  %v860_v3 = vld [vmem:[%s1269_s2 + $0x10] sm:$0xff]   ;;  %v113_v4 = vld [vmem:[%s1267_s0] sm:$0xff]  ;;  %vm149_vm1 = vcmask 392192   ;;  %v862_v7 = vld [vmem:[#allocation2 + $0x8] sm:$0xff]   ;;  %vm439_vm2 = vcmask 130048   ;;  %vm506_vm3 = vcmask 523264  }
  0x6d   :  { %790 = vmatprep.subr.bf16.mxu0 %v1044_v0  ;;  %806 = vmatprep.mubr.msk.bf16.mxu0 %vm1045_vm0, %v1044_v0  ;;  %v1217_v5 = vpack.c.bf16 %v113_v4, %v113_v4  ;;  %v861_v6 = vld [vmem:[#allocation2] sm:$0xff]   ;;  %v863_v8 = vld [vmem:[#allocation2 + $0x10] sm:$0xff]   ;;  %v864_v9 = vld [vmem:[#allocation2 + $0x18] sm:$0xff]  }
  0x6e   :  { %761 = vmatpush3.bf16.msra.mxu1 %v858_v1  ;;  %v865_v10 = vld [vmem:[#allocation2 + $0x20] sm:$0xff]   ;;  %v866_v11 = vld [vmem:[#allocation2 + $0x28] sm:$0xff]   ;;  %v867_v12 = vld [vmem:[#allocation2 + $0x30] sm:$0xff]  }
  0x6f   :  { %762 = vmatprep.subr.bf16.mxu1 %v1044_v0  ;;  %v868_v13 = vld [vmem:[#allocation2 + $0x38] sm:$0xff]   ;;  %v869_v14 = vld [vmem:[#allocation4] sm:$0xff]   ;;  %v870_v15 = vld [vmem:[#allocation4 + $0x8] sm:$0xff]  }
  0x70   :  { %791 = vmatpush3.bf16.msra.mxu0 %v869_v14  ;;  %v871_v16 = vld [vmem:[#allocation4 + $0x10] sm:$0xff]   ;;  %v872_v17 = vld [vmem:[#allocation4 + $0x18] sm:$0xff]   ;;  %v873_v18 = vld [vmem:[#allocation4 + $0x20] sm:$0xff]  }
  0x71   :  { %792 = vmatprep.subr.bf16.mxu0 %v1044_v0  ;;  %v874_v19 = vld [vmem:[#allocation4 + $0x28] sm:$0xff]   ;;  %v875_v28 = vld [vmem:[#allocation4 + $0x30] sm:$0xff]   ;;  %v876_v29 = vld [vmem:[#allocation4 + $0x38] sm:$0xff]  }
  0x72   :  { %763 = vmatpush3.bf16.msra.mxu1 %v859_v2  ;;  %v681_v20 = vld [vmem:[#allocation10] ss:$0 sm:$0xff]  ;;  %v686_v30 = vld [vmem:[#allocation10 + $0x1] ss:$0 sm:$0xff]  ;;  %v877_v38 = vld [vmem:[#allocation7] sm:$0xff]  }
  0x73   :  { %764 = vmatprep.subr.bf16.mxu1 %v1044_v0  ;;  %v878_v39 = vld [vmem:[#allocation6] sm:$0xff]   ;;  %v879_v40 = vld [vmem:[#allocation6 + $0x8] sm:$0xff]   ;;  %v880_v46 = vld [vmem:[#allocation6 + $0x10] sm:$0xff]  }
  0x74   :  { %793 = vmatpush3.bf16.msra.mxu0 %v870_v15  ;;  %v695_v41 = vld [vmem:[#allocation10 + $0x2] ss:$0 sm:$0xff]  ;;  %v881_v50 = vld [vmem:[#allocation6 + $0x18] sm:$0xff]   ;;  %v883_v52 = vld [vmem:[#allocation9 + $0x8] sm:$0xff]  }
  0x75   :  { %794 = vmatprep.subr.bf16.mxu0 %v1044_v0  ;;  %v882_v51 = vld [vmem:[#allocation9] sm:$0xff]   ;;  %v884_v54 = vld [vmem:[#allocation9 + $0x10] sm:$0xff]   ;;  %v885_v55 = vld [vmem:[#allocation9 + $0x18] sm:$0xff]  }
  0x76   :  { %765 = vmatpush3.bf16.msra.mxu1 %v860_v3  ;;  %v886_v56 = vld [vmem:[#allocation9 + $0x20] sm:$0xff]   ;;  %v887_v57 = vld [vmem:[#allocation9 + $0x28] sm:$0xff]   ;;  %v114_v62 = vld [vmem:[%s1268_s1] sm:$0xff] }
  0x77   :  { %770 = vmatprep.subr.bf16.mxu1 %v1044_v0  ;;  %v888_v4 = vld [vmem:[#allocation9 + $0x30] sm:$0xff]   ;;  %v712_v15 = vld [vmem:[#allocation10 + $0x4] ss:$0 sm:$0xff] }
  0x78   :  { %795 = vmatpush3.bf16.msra.mxu0 %v871_v16 }
  0x79   :  { %767 = vmatmul.mubr.msk.bf16.vlgmr.msra.gmra.mrb[0].mxu1 %vm149_vm1, %v1217_v5  ;;  %796 = vmatprep.subr.bf16.mxu0 %v1044_v0 }
  0x7a   :  { %771 = vmatpush3.bf16.msra.mxu1 %v861_v6  ;;  %786 = vmatprep.mubr.msk.bf16.mxu1 %vm1045_vm0, %v1044_v0  ;;  %v711_v6 = vld [vmem:[#allocation10 + $0x3] ss:$0 sm:$0xff] }
  0x7b   :  { %772 = vmatprep.subr.bf16.mxu1 %v1044_v0 }
  0x7c   :  { %797 = vmatpush3.bf16.msra.mxu0 %v872_v17 }
  0x7d   :  { %798 = vmatprep.subr.bf16.mxu0 %v1044_v0 }
  0x7e   :  { %773 = vmatpush3.bf16.msra.mxu1 %v862_v7 }
  0x7f   :  { %774 = vmatprep.subr.bf16.mxu1 %v1044_v0 }
  0x80   :  { %799 = vmatpush3.bf16.msra.mxu0 %v873_v18 }
  0x81   :  { %800 = vmatprep.subr.bf16.mxu0 %v1044_v0 }
  0x82   :  { %775 = vmatpush3.bf16.msra.mxu1 %v863_v8 }
  0x83   :  { %776 = vmatprep.subr.bf16.mxu1 %v1044_v0 }
  0x84   :  { %801 = vmatpush3.bf16.msra.mxu0 %v874_v19 }
  0x85   :  { %802 = vmatprep.subr.bf16.mxu0 %v1044_v0 }
  0x86   :  { %777 = vmatpush3.bf16.msra.mxu1 %v864_v9 }
  0x87   :  { %778 = vmatprep.subr.bf16.mxu1 %v1044_v0 }
  0x88   :  { %803 = vmatpush3.bf16.msra.mxu0 %v875_v28 }
  0x89   :  { %804 = vmatprep.subr.bf16.mxu0 %v1044_v0 }
  0x8a   :  { %779 = vmatpush3.bf16.msra.mxu1 %v865_v10 }
  0x8b   :  { %780 = vmatprep.subr.bf16.mxu1 %v1044_v0 }
  0x8c   :  { %805 = vmatpush3.bf16.msra.mxu0 %v876_v29 }
  0x8d   :  { %828 = vmatprep.subr.bf16.mxu0 %v1044_v0 }
  0x8e   :  { %781 = vmatpush3.bf16.msra.mxu1 %v866_v11 }
  0x8f   :  { %782 = vmatprep.subr.bf16.mxu1 %v1044_v0 }
  0x92   :  { %783 = vmatpush3.bf16.msra.mxu1 %v867_v12 }
  0x93   :  { %784 = vmatprep.subr.bf16.mxu1 %v1044_v0 }
  0x96   :  { %785 = vmatpush3.bf16.msra.mxu1 %v868_v13 }
  0x97   :  { %810 = vmatprep.subr.bf16.mxu1 %v1044_v0 }
 0x14c   :  { %v187_v21 = vpop.f32.mrb[0].mxu1 }
 0x14d   :  { %v188_v22 = vadd.f32 %v681_v20, %v187_v21  ;;  %v768_v23 = vpop.f32.mrb[1].mxu1 }
 0x14e   :  { %v190_v24 = vpop.f32.mrb[2].mxu1 }
 0x14f   :  { %v193_v25 = vmax.f32 %v188_v22, 0.0  ;;  %v769_v26 = vpop.f32.mrb[3].mxu1 }
 0x151   :  { %v194_v27 = vpack.c.bf16 %v193_v25, %v193_v25 }
 0x153   :  { %787 = vmatmul.mubr.bf16.vlgmr.msra.gmra.mrb[4].mxu1 %v194_v27 }
 0x154   :  { %812 = vmatprep.mubr.msk.bf16.mxu1 %vm1045_vm0, %v1044_v0  ;;  %811 = vmatpush3.bf16.msra.mxu1 %v877_v38 }
 0x155   :  { %816 = vmatprep.subr.bf16.mxu1 %v1044_v0 }
 0x15b   :  { %813 = vmatmul.mubr.msk.bf16.vlgmr.msra.gmra.mrb[8].mxu1 %vm439_vm2, %v1217_v5  ;;  %v889_v5 = vld [vmem:[#allocation9 + $0x38] sm:$0xff]  }
 0x15c   :  { %817 = vmatpush3.bf16.msra.mxu1 %v878_v39  ;;  %824 = vmatprep.mubr.msk.bf16.mxu1 %vm1045_vm0, %v1044_v0 }
 0x15d   :  { %818 = vmatprep.subr.bf16.mxu1 %v1044_v0 }
 0x160   :  { %819 = vmatpush3.bf16.msra.mxu1 %v879_v40 }
 0x161   :  { %820 = vmatprep.subr.bf16.mxu1 %v1044_v0 }
 0x164   :  { %821 = vmatpush3.bf16.msra.mxu1 %v880_v46 }
 0x165   :  { %822 = vmatprep.subr.bf16.mxu1 %v1044_v0 }
 0x168   :  { %823 = vmatpush3.bf16.msra.mxu1 %v881_v50 }
 0x226   :  { %v297_v31 = vpop.f32.mrb[4].mxu1 }
 0x227   :  { %v298_v32 = vadd.f32 %v686_v30, %v297_v31  ;;  %v788_v33 = vpop.f32.mrb[5].mxu1 }
 0x228   :  { %v300_v34 = vpop.f32.mrb[6].mxu1 }
 0x229   :  { %v303_v35 = vmax.f32 %v298_v32, 0.0  ;;  %v789_v36 = vpop.f32.mrb[7].mxu1 }
 0x22b   :  { %v304_v37 = vpack.c.bf16 %v303_v35, %v303_v35 }
 0x22d   :  { %807 = vmatmul.mubr.bf16.vlgmr.msra.gmra.mrb[0].mxu0 %v304_v37 }
 0x22e   :  { %844 = vmatprep.mubr.msk.bf16.mxu0 %vm1045_vm0, %v1044_v0  ;;  %829 = vmatpush3.bf16.msra.mxu0 %v882_v51  ;;  %v476_v58 = vpop.f32.mrb[8].mxu1 }
 0x22f   :  { %830 = vmatprep.subr.bf16.mxu0 %v1044_v0  ;;  %v814_v59 = vpop.f32.mrb[9].mxu1 }
 0x230   :  { %v479_v60 = vpop.f32.mrb[10].mxu1 }
 0x231   :  { %v815_v61 = vpop.f32.mrb[11].mxu1 }
 0x232   :  { %831 = vmatpush3.bf16.msra.mxu0 %v883_v52 }
 0x233   :  { %832 = vmatprep.subr.bf16.mxu0 %v1044_v0 }
 0x236   :  { %833 = vmatpush3.bf16.msra.mxu0 %v884_v54 }
 0x237   :  { %834 = vmatprep.subr.bf16.mxu0 %v1044_v0 }
 0x23a   :  { %835 = vmatpush3.bf16.msra.mxu0 %v885_v55 }
 0x23b   :  { %836 = vmatprep.subr.bf16.mxu0 %v1044_v0 }
 0x23e   :  { %837 = vmatpush3.bf16.msra.mxu0 %v886_v56 }
 0x23f   :  { %838 = vmatprep.subr.bf16.mxu0 %v1044_v0 }
 0x242   :  { %839 = vmatpush3.bf16.msra.mxu0 %v887_v57 }
 0x243   :  { %840 = vmatprep.subr.bf16.mxu0 %v1044_v0 }
 0x246   :  { %841 = vmatpush3.bf16.msra.mxu0 %v888_v4 }
 0x247   :  { %842 = vmatprep.subr.bf16.mxu0 %v1044_v0 }
 0x24a   :  { %843 = vmatpush3.bf16.msra.mxu0 %v889_v5 }
 0x300   :  { %v407_v42 = vpop.f32.mrb[0].mxu0 }
 0x301   :  { %v408_v43 = vadd.f32 %v695_v41, %v407_v42  ;;  %v808_v44 = vpop.f32.mrb[1].mxu0 }
 0x302   :  { %v410_v45 = vpop.f32.mrb[2].mxu0 }
 0x303   :  { %672 = vst [vmem:[%s1276_s9 + $0x8] sm:$0xff] %v408_v43  ;;  %v809_v47 = vpop.f32.mrb[3].mxu0  ;;  %v413_v48 = vmul.f32 0.5, %v408_v43 }
 0x305   :  { %v414_v49 = vmul.f32 1.442695, %v413_v48 }
 0x307   :  { %890 = vpow2.f32 %v414_v49 }
 0x311   :  { %v891_v53 = vpop.eup %890 }
 0x312   :  { %417 = vrot.lane.b32.xlu0 %v891_v53, %s1038_s21 }
 0x384   :  { %v418_v63 = vpop.permute.xlu0 %417 }
 0x385   :  { %v420_v1 = vmul.f32 %v418_v63, %v114_v62 }
 0x387   :  { %v421_v2 = vadd.f32 %v420_v1, %v408_v43 }
 0x389   :  { %v422_v3 = vpack.c.bf16 %v421_v2, %v421_v2 }
 0x38b   :  { %825 = vmatmul.mubr.msk.bf16.vlgmr.msra.gmra.mrb[12].mxu1 %vm506_vm3, %v422_v3 }
 0x45e   :  { %v544_v7 = vpop.f32.mrb[12].mxu1 }
 0x45f   :  { %v545_v8 = vadd.f32 %v544_v7, %v476_v58  ;;  %v826_v9 = vpop.f32.mrb[13].mxu1 }
 0x460   :  { %v547_v10 = vpop.f32.mrb[14].mxu1 }
 0x461   :  { %v554_v11 = vadd.f32 %v711_v6, %v545_v8  ;;  %v827_v12 = vpop.f32.mrb[15].mxu1 }
 0x463   :  { %v555_v13 = vmax.f32 %v554_v11, 0.0 }
 0x465   :  { %v556_v14 = vpack.c.bf16 %v555_v13, %v555_v13 }
 0x467   :  { %845 = vmatmul.mubr.bf16.vlgmr.msra.gmra.mrb[4].mxu0 %v556_v14 }
 0x53a   :  { %v659_v16 = vpop.f32.mrb[4].mxu0 }
 0x53b   :  { %v660_v17 = vadd.f32 %v712_v15, %v659_v16  ;;  %v846_v18 = vpop.f32.mrb[5].mxu0 }
 0x53c   :  { %v662_v19 = vpop.f32.mrb[6].mxu0 }
 0x53d   :  { %v721_v20 = vmul.f32 -1.442695, %v660_v17  ;;  %v847_v21 = vpop.f32.mrb[7].mxu0 }
 0x53f   :  { %892 = vpow2.f32 %v721_v20 }
 0x549   :  { %v893_v0 = vpop.eup %892 }
 0x54a   :  { %v668_v22 = vadd.f32 1.0, %v893_v0 }
 0x54c   :  { %894 = vrcp.f32 %v668_v22 }
 0x556   :  { %v895_v23 = vpop.eup %894 }
 0x557   :  { %671 = vst [vmem:[%s1276_s9] sm:$0xff] %v895_v23 }
 0x558   :  { %677 = vsyncpa [#allocation3], 1 }
 0x559   :  { %678 = vsyncpa [#allocation5], 1 }
 0x55a   :  { %679 = vsyncpa [#allocation8], 1 }
 0x55b   :  { %680 = vsyncpa [#allocation11], 1 }

</bundles_post_ra>
